<compile_context>
chip_gen: v7x
topology: tpu7x:2x2x1
jax: 0.10.0
libtpu: 0.0.40
codegen_flags: <defaults>
</compile_context>

<pallas_src>
import jax
import jax.numpy as jnp
from jax.experimental import pallas as pl
from jax.experimental.pallas import tpu as pltpu

IN_FEAT = 28 * 28      # 784
HID_FEAT = 16 * 16     # 256
OUT_FEAT = 1
NEG_SLOPE = 0.2


def _round_up(x, m):
    return (x + m - 1) // m * m


def _choose_tile(batch, batch_tile):
    """Batch tile: multiple of 16, capped at batch_tile, and (when the batch is
    large enough) sized so the grid has >= 2 steps for v7x's two TensorCores."""
    half = _round_up(max(1, (batch + 1) // 2), 16)
    tb = max(16, min(batch_tile, half))
    padded = _round_up(batch, tb)
    return tb, padded


def _gan_d_kernel(x_ref, w1_ref, b1_ref, w2_ref, b2_ref, o_ref):
    # ---- Linear 1 on the MXU: cast x to bf16 in-kernel, accumulate in f32 ----
    x_bf = x_ref[...].astype(jnp.bfloat16)                    # (TB, 784)
    h = jnp.dot(x_bf, w1_ref[...], preferred_element_type=jnp.float32)
    h = h + b1_ref[...]                                       # (TB, 256) f32
    # ---- LeakyReLU(0.2) on the VPU (f32) ----
    h = jnp.where(h >= 0.0, h, NEG_SLOPE * h)
    # ---- Linear 2 (N == 1): VPU multiply + XLU lane reduction, not the MXU ----
    logit = jnp.sum(h * w2_ref[...], axis=-1, keepdims=True)  # (TB, 1) f32
    logit = logit + b2_ref[0, 0]                              # scalar bias (SMEM)
    # ---- Sigmoid: exact (EUP exp + divide); EUP has plenty of slack here ----
    o_ref[...] = (1.0 / (1.0 + jnp.exp(-logit))).astype(o_ref.dtype)


def gan_d_forward(inputs, w1, b1, w2, b2, *, batch_tile=2048):
    """inputs: (B, 1, 28, 28) float32 (NCHW). Returns (B, 1) float32."""
    batch = inputs.shape[0]
    x = inputs.reshape(batch, -1)            # == inputs.view(batch_size, -1)

    tb, padded = _choose_tile(batch, batch_tile)
    if padded != batch:
        x = jnp.pad(x, ((0, padded - batch), (0, 0)))

    # Only the tiny, VMEM-resident w1 is pre-cast to bf16; x stays f32 and is
    # cast inside the kernel (no extra HBM pass over the big activation).
    w1_bf = w1.astype(jnp.bfloat16)
    b1_row = b1.reshape(1, HID_FEAT).astype(jnp.float32)
    w2_row = w2.reshape(1, HID_FEAT).astype(jnp.float32)   # row form for VPU reduce
    b2_s = b2.reshape(1, 1).astype(jnp.float32)

    grid = (padded // tb,)

    flops = 2 * padded * IN_FEAT * HID_FEAT + 3 * padded * HID_FEAT
    bytes_accessed = (padded * IN_FEAT * 4          # x (f32, streamed)
                      + w1_bf.size * 2
                      + (b1_row.size + w2_row.size + b2_s.size) * 4
                      + padded * OUT_FEAT * 4)

    out = pl.pallas_call(
        _gan_d_kernel,
        out_shape=jax.ShapeDtypeStruct((padded, OUT_FEAT), jnp.float32),
        grid=grid,
        in_specs=[
            pl.BlockSpec((tb, IN_FEAT), lambda i: (i, 0)),        # x: streamed f32 tiles
            pl.BlockSpec((IN_FEAT, HID_FEAT), lambda i: (0, 0)),  # w1: VMEM-resident bf16
            pl.BlockSpec((1, HID_FEAT), lambda i: (0, 0)),        # b1: VMEM-resident
            pl.BlockSpec((1, HID_FEAT), lambda i: (0, 0)),        # w2 row: resident
            pl.BlockSpec(memory_space=pltpu.MemorySpace.SMEM),    # b2 scalar in SMEM
        ],
        out_specs=pl.BlockSpec((tb, OUT_FEAT), lambda i: (i, 0)),
        compiler_params=pltpu.CompilerParams(
            dimension_semantics=("parallel",),
            vmem_limit_bytes=32 * 1024 * 1024),
        cost_estimate=pl.CostEstimate(
            flops=flops,
            transcendentals=padded,
            bytes_accessed=bytes_accessed),
    )(x, w1_bf, b1_row, w2_row, b2_s)

    return out[:batch]


def init_params(key):
    """Deterministic parameter init, shapes match torch.nn.Linear layers.
    Stored as (in, out) so the kernel avoids transposes."""
    k1, k2, k3, k4 = jax.random.split(key, 4)
    bound1 = 1.0 / jnp.sqrt(IN_FEAT)
    bound2 = 1.0 / jnp.sqrt(HID_FEAT)
    w1 = jax.random.uniform(k1, (IN_FEAT, HID_FEAT), jnp.float32, -bound1, bound1)
    b1 = jax.random.uniform(k2, (1, HID_FEAT), jnp.float32, -bound1, bound1)
    w2 = jax.random.uniform(k3, (HID_FEAT, OUT_FEAT), jnp.float32, -bound2, bound2)
    b2 = jax.random.uniform(k4, (1, OUT_FEAT), jnp.float32, -bound2, bound2)
    return w1, b1, w2, b2


if __name__ == "__main__":
    key = jax.random.PRNGKey(0)
    kx, kp = jax.random.split(key)

    batch_size = 8
    # NCHW MNIST-like input, same as what the PyTorch discriminator consumes.
    inputs = jax.random.normal(kx, (batch_size, 1, 28, 28), dtype=jnp.float32)
    w1, b1, w2, b2 = init_params(kp)

    out = gan_d_forward(inputs, w1, b1, w2, b2)
    out = jax.block_until_ready(out)

    # Pure-f32 reference (exact PyTorch semantics). Tolerance covers the bf16
    # MXU inputs (sigmoid output is in [0,1], so 5e-3 absolute is meaningful).
    x = inputs.reshape(batch_size, -1)
    h = x @ w1 + b1
    h = jnp.where(h >= 0, h, 0.2 * h)
    ref = jax.nn.sigmoid(h @ w2 + b2)

    assert out.shape == (batch_size, 1)
    assert jnp.allclose(out, ref, atol=5e-3, rtol=0.0)

    print("KERNEL_OK")
</pallas_src>

<mosaic_0001>
module attributes {stable_mosaic.version = 11 : i64} {
  func.func @_gan_d_kernel(%arg0: i32, %arg1: memref<16x784xf32, #tpu.memory_space<vmem>>, %arg2: memref<784x256xbf16, #tpu.memory_space<vmem>>, %arg3: memref<1x256xf32, #tpu.memory_space<vmem>>, %arg4: memref<1x256xf32, #tpu.memory_space<vmem>>, %arg5: memref<1x1xf32, #tpu.memory_space<smem>>, %arg6: memref<16x1xf32, #tpu.memory_space<vmem>>) attributes {dimension_semantics = [#tpu.dimension_semantics<parallel>], iteration_bounds = array<i64: 1>, scalar_prefetch = 0 : i64, scratch_operands = 0 : i64, tpu.core_type = #tpu.core_type<tc>, window_params = [{transform_indices = @transform_0, window_bounds = array<i64: 16, 784>}, {pipeline_mode = #tpu.pipeline_mode<synchronous>, transform_indices = @transform_1, window_bounds = array<i64: 784, 256>}, {pipeline_mode = #tpu.pipeline_mode<synchronous>, transform_indices = @transform_2, window_bounds = array<i64: 1, 256>}, {pipeline_mode = #tpu.pipeline_mode<synchronous>, transform_indices = @transform_3, window_bounds = array<i64: 1, 256>}, {transform_indices = @transform_4, window_bounds = array<i64: 1, 1>}, {transform_indices = @transform_5, window_bounds = array<i64: 16, 1>}]} {
    %c0 = arith.constant 0 : index
    %c0_0 = arith.constant 0 : index
    %0 = vector.load %arg1[%c0, %c0_0] : memref<16x784xf32, #tpu.memory_space<vmem>>, vector<16x784xf32>
    %1 = arith.truncf %0 : vector<16x784xf32> to vector<16x784xbf16>
    %c0_1 = arith.constant 0 : index
    %c0_2 = arith.constant 0 : index
    %2 = vector.load %arg2[%c0_1, %c0_2] : memref<784x256xbf16, #tpu.memory_space<vmem>>, vector<784x256xbf16>
    %cst = arith.constant dense<0.000000e+00> : vector<16x256xf32>
    %3 = tpu.matmul %1, %2, %cst {dimension_numbers = #tpu.dot_dimension_numbers<[1], [0], [0], [1], [0, 0, 1, 1], [], []>} : vector<16x784xbf16>, vector<784x256xbf16>, vector<16x256xf32> -> vector<16x256xf32>
    %c0_3 = arith.constant 0 : index
    %c0_4 = arith.constant 0 : index
    %4 = vector.load %arg3[%c0_3, %c0_4] : memref<1x256xf32, #tpu.memory_space<vmem>>, vector<1x256xf32>
    %5 = vector.broadcast %4 : vector<1x256xf32> to vector<16x256xf32>
    %6 = arith.addf %3, %5 : vector<16x256xf32>
    %cst_5 = arith.constant 0.000000e+00 : f32
    %7 = vector.broadcast %cst_5 : f32 to vector<16x256xf32>
    %8 = arith.cmpf oge, %6, %7 : vector<16x256xf32>
    %cst_6 = arith.constant 2.000000e-01 : f32
    %9 = vector.broadcast %cst_6 : f32 to vector<16x256xf32>
    %10 = arith.mulf %9, %6 : vector<16x256xf32>
    %11 = arith.select %8, %6, %10 : vector<16x256xi1>, vector<16x256xf32>
    %c0_7 = arith.constant 0 : index
    %c0_8 = arith.constant 0 : index
    %12 = vector.load %arg4[%c0_7, %c0_8] : memref<1x256xf32, #tpu.memory_space<vmem>>, vector<1x256xf32>
    %13 = vector.broadcast %12 : vector<1x256xf32> to vector<16x256xf32>
    %14 = arith.mulf %11, %13 : vector<16x256xf32>
    %cst_9 = arith.constant dense<0.000000e+00> : vector<16xf32>
    %15 = vector.multi_reduction <add>, %14, %cst_9 [1] : vector<16x256xf32> to vector<16xf32>
    %16 = vector.shape_cast %15 : vector<16xf32> to vector<16x1xf32>
    %c0_10 = arith.constant 0 : index
    %c0_11 = arith.constant 0 : index
    %17 = memref.load %arg5[%c0_10, %c0_11] : memref<1x1xf32, #tpu.memory_space<smem>>
    %18 = vector.broadcast %17 : f32 to vector<16x1xf32>
    %19 = arith.addf %16, %18 : vector<16x1xf32>
    %cst_12 = arith.constant 0.000000e+00 : f32
    %20 = vector.broadcast %cst_12 : f32 to vector<16x1xf32>
    %21 = arith.subf %20, %19 : vector<16x1xf32>
    %22 = math.exp %21 : vector<16x1xf32>
    %cst_13 = arith.constant 1.000000e+00 : f32
    %23 = vector.broadcast %cst_13 : f32 to vector<16x1xf32>
    %24 = arith.addf %23, %22 : vector<16x1xf32>
    %cst_14 = arith.constant 1.000000e+00 : f32
    %25 = vector.broadcast %cst_14 : f32 to vector<16x1xf32>
    %26 = arith.divf %25, %24 : vector<16x1xf32>
    %c0_15 = arith.constant 0 : index
    %c0_16 = arith.constant 0 : index
    %27 = vector.load %arg6[%c0_15, %c0_16] : memref<16x1xf32, #tpu.memory_space<vmem>>, vector<16x1xf32>
    tpu.vector_store %arg6[%c0_15, %c0_16], %26 {strides = array<i32>} : memref<16x1xf32, #tpu.memory_space<vmem>>, vector<16x1xf32>,
    return
  }
  func.func @transform_0(%arg0: i32) -> (i32, i32) {
    %c0_i32 = arith.constant 0 : i32
    %c0_i32_0 = arith.constant 0 : i32
    return %arg0, %c0_i32 : i32, i32
  }
  func.func @transform_1(%arg0: i32) -> (i32, i32) {
    %c0_i32 = arith.constant 0 : i32
    %c0_i32_0 = arith.constant 0 : i32
    %c0_i32_1 = arith.constant 0 : i32
    return %c0_i32, %c0_i32_0 : i32, i32
  }
  func.func @transform_2(%arg0: i32) -> (i32, i32) {
    %c0_i32 = arith.constant 0 : i32
    %c0_i32_0 = arith.constant 0 : i32
    %c0_i32_1 = arith.constant 0 : i32
    return %c0_i32, %c0_i32_0 : i32, i32
  }
  func.func @transform_3(%arg0: i32) -> (i32, i32) {
    %c0_i32 = arith.constant 0 : i32
    %c0_i32_0 = arith.constant 0 : i32
    %c0_i32_1 = arith.constant 0 : i32
    return %c0_i32, %c0_i32_0 : i32, i32
  }
  func.func @transform_4(%arg0: i32) -> (i32, i32) {
    %c0_i32 = arith.constant 0 : i32
    %c0_i32_0 = arith.constant 0 : i32
    %c0_i32_1 = arith.constant 0 : i32
    return %c0_i32, %c0_i32_0 : i32, i32
  }
  func.func @transform_5(%arg0: i32) -> (i32, i32) {
    %c0_i32 = arith.constant 0 : i32
    %c0_i32_0 = arith.constant 0 : i32
    return %arg0, %c0_i32 : i32, i32
  }
}

</mosaic_0001>

<bundles_post_ra>
// kernel: tpu_custom_call.1
= control target key start
LH: loop header
LB: loop body
LE: loop exit
PB: predicated region body
PF: predicated region fallthrough
CT: control target
= control target key end

     0   :  { %11 = vsyncpa [#allocation4], 0  ;;  %s1307_s0 = inlined_call_operand.hbm [shape: f32[16,784], index: 0, kind: input, shape index: {}]   ;;  %s1308_s1 = inlined_call_operand.hbm [shape: bf16[784,256], index: 1, kind: input, shape index: {}]   ;;  %s1309_s2 = inlined_call_operand.vmem [shape: f32[1,256], index: 2, kind: input, shape index: {}]   ;;  %s1310_s3 = inlined_call_operand.vmem [shape: f32[1,256], index: 3, kind: input, shape index: {}]   ;;  %s1311_s4 = inlined_call_operand.<no memory space> [shape: f32[1,1], index: 4, kind: input, shape index: {}]   ;;  %s1312_s5 = inlined_call_operand.vmem [shape: f32[16,1], index: 5, kind: output, shape index: {}]  }
   0x1   :  { %12 = vsyncpa [#allocation6], 0  ;;  %s1231_s18 = smov [#allocation3]   ;;  %s1183_s22 = scalar_lea.hbm %s1307_s0, 1792 }
   0x2   :  { %s18_s19 = sshll.u32 %s1231_s18, 4  ;;  %p1184_p0 = scmp.ne.s32.totalorder %s1307_s0, %s1183_s22  ;;  %s19_s19 = int_to_ptr.vmem [resolvable:$true] %s18_s19 }
   0x3   :  { %p1187_p1 = scmp.lt.u32.totalorder %s1183_s22, %s1307_s0 }
   0x5   :  { %p1189_p2 = pnand %p1187_p1, %p1184_p0 }
   0x7   :  { %1192 = shalt.err (!%p1189_p2)
}
   0x8   :  { %s1193_s27 = scalar_lea.vmem %s19_s19, 1792  ;;  %p1198_p4 = scmp.lt.s32.totalorder %s19_s19, %s19_s19 }
   0x9   :  { %p1194_p3 = scmp.ne.s32.totalorder %s19_s19, %s1193_s27  ;;  %p1199_p5 = scmp.lt.s32.totalorder %s1193_s27, %s1193_s27 }
   0xb   :  { %p1200_p6 = por %p1199_p5, %p1198_p4 }
   0xd   :  { %p1201_p7 = pnand %p1200_p6, %p1194_p3 }
   0xf   :  { %1204 = shalt.err (!%p1201_p7)
}
  0x10   :  { %s1232_s28 = smov 896   ;;  %s1233_s29 = smov 56  }
  0x11   :  { %24 = dma.hbm_to_vmem [thread:$0]  %s1307_s0, 1792, %s19_s19, [#allocation4], %s1232_s28, %s1232_s28, %s1233_s29  }
  0x12   :  { %s1234_s7 = smov [#allocation5]   ;;  %s1205_s11 = scalar_lea.hbm %s1308_s1, 12544 }
  0x13   :  { %s30_s8 = sshll.u32 %s1234_s7, 4  ;;  %p1206_p8 = scmp.ne.s32.totalorder %s1308_s1, %s1205_s11  ;;  %s31_s8 = int_to_ptr.vmem [resolvable:$true] %s30_s8 }
  0x14   :  { %p1209_p9 = scmp.lt.u32.totalorder %s1205_s11, %s1308_s1 }
  0x16   :  { %p1211_p10 = pnand %p1209_p9, %p1206_p8 }
  0x18   :  { %1214 = shalt.err (!%p1211_p10)
}
  0x19   :  { %s1215_s16 = scalar_lea.vmem %s31_s8, 12544  ;;  %p1220_p12 = scmp.lt.s32.totalorder %s31_s8, %s31_s8 }
  0x1a   :  { %p1216_p11 = scmp.ne.s32.totalorder %s31_s8, %s1215_s16  ;;  %p1221_p13 = scmp.lt.s32.totalorder %s1215_s16, %s1215_s16 }
  0x1c   :  { %p1222_p0 = por %p1221_p13, %p1220_p12 }
  0x1e   :  { %p1223_p1 = pnand %p1222_p0, %p1216_p11 }
  0x20   :  { %1226 = shalt.err (!%p1223_p1)
}
  0x21   :  { %s1235_s0 = smov 128   ;;  %s1236_s17 = smov 8  }
  0x22   :  { %36 = dma.hbm_to_vmem [thread:$0]  %s1308_s1, 12544, %s31_s8, [#allocation6], %s1235_s0, %s1235_s0, %s1236_s17  }
  0x23   :  { %1227 = dma.done.wait [#allocation4], 1792  }
  0x24   :  { %1228 = vsyncadd [#allocation4], 4294965504 }
  0x25   :  { %1229 = dma.done.wait [#allocation6], 12544  }
  0x26   :  { %1230 = vsyncadd [#allocation6], 4294954752  ;;  %v1028_v0 = vld [vmem:[#allocation5 + $0x4] ss:$8 sps:$4 sm:$0xff]   ;;  %v1030_v1 = vld [vmem:[#allocation5] ss:$8 sps:$4 sm:$0xff]  }
  0x27   :  { %675 = vmatprep.subr.bf16.mxu1 %v1028_v0  ;;  %v1031_v2 = vld [vmem:[#allocation5 + $0x14] ss:$8 sps:$4 sm:$0xff]   ;;  %v1033_v3 = vld [vmem:[#allocation5 + $0x10] ss:$8 sps:$4 sm:$0xff]   ;;  %v1034_v4 = vld [vmem:[#allocation5 + $0x24] ss:$8 sps:$4 sm:$0xff]  }
  0x28   :  { %676 = vmatpush1.bf16.msra.mxu1 %v1030_v1  ;;  %v1036_v5 = vld [vmem:[#allocation5 + $0x20] ss:$8 sps:$4 sm:$0xff]   ;;  %v1037_v6 = vld [vmem:[#allocation5 + $0x34] ss:$8 sps:$4 sm:$0xff]   ;;  %v1039_v7 = vld [vmem:[#allocation5 + $0x30] ss:$8 sps:$4 sm:$0xff]  }
  0x29   :  { %677 = vmatprep.subr.bf16.mxu1 %v1031_v2  ;;  %v1040_v8 = vld [vmem:[#allocation5 + $0x44] ss:$8 sps:$4 sm:$0xff]   ;;  %v1042_v10 = vld [vmem:[#allocation5 + $0x40] ss:$8 sps:$4 sm:$0xff]   ;;  %v1043_v11 = vld [vmem:[#allocation5 + $0x54] ss:$8 sps:$4 sm:$0xff]  }
  0x2a   :  { %v1058_v9 = vld [vmem:[#allocation5 + $0x204] ss:$8 sps:$4 sm:$0xff]   ;;  %v1062_v12 = vld [vmem:[#allocation5 + $0x200] ss:$8 sps:$4 sm:$0xff]   ;;  %v1064_v13 = vld [vmem:[#allocation5 + $0x214] ss:$8 sps:$4 sm:$0xff]  }
  0x2b   :  { %761 = vmatprep.subr.bf16.mxu0 %v1058_v9  ;;  %v1045_v14 = vld [vmem:[#allocation5 + $0x50] ss:$8 sps:$4 sm:$0xff]   ;;  %v1070_v16 = vld [vmem:[#allocation5 + $0x224] ss:$8 sps:$4 sm:$0xff]   ;;  %v1074_v18 = vld [vmem:[#allocation5 + $0x220] ss:$8 sps:$4 sm:$0xff]  }
  0x2c   :  { %678 = vmatpush1.bf16.msra.mxu1 %v1033_v3  ;;  %762 = vmatpush1.bf16.msra.mxu0 %v1062_v12  ;;  %v1068_v15 = vld [vmem:[#allocation5 + $0x210] ss:$8 sps:$4 sm:$0xff]   ;;  %v1046_v17 = vld [vmem:[#allocation5 + $0x64] ss:$8 sps:$4 sm:$0xff]   ;;  %v1076_v19 = vld [vmem:[#allocation5 + $0x234] ss:$8 sps:$4 sm:$0xff]  }
  0x2d   :  { %679 = vmatprep.subr.bf16.mxu1 %v1034_v4  ;;  %763 = vmatprep.subr.bf16.mxu0 %v1064_v13  ;;  %v1048_v20 = vld [vmem:[#allocation5 + $0x60] ss:$8 sps:$4 sm:$0xff]   ;;  %v1049_v21 = vld [vmem:[#allocation5 + $0x74] ss:$8 sps:$4 sm:$0xff]   ;;  %v1080_v22 = vld [vmem:[#allocation5 + $0x230] ss:$8 sps:$4 sm:$0xff]  }
  0x2e   :  { %v1082_v23 = vld [vmem:[#allocation5 + $0x244] ss:$8 sps:$4 sm:$0xff]   ;;  %v1051_v24 = vld [vmem:[#allocation5 + $0x70] ss:$8 sps:$4 sm:$0xff]   ;;  %v1086_v26 = vld [vmem:[#allocation5 + $0x240] ss:$8 sps:$4 sm:$0xff]  }
  0x2f   :  { %v1052_v25 = vld [vmem:[#allocation5 + $0x84] ss:$8 sps:$4 sm:$0xff]   ;;  %v1088_v27 = vld [vmem:[#allocation5 + $0x254] ss:$8 sps:$4 sm:$0xff]   ;;  %v1054_v30 = vld [vmem:[#allocation5 + $0x80] ss:$8 sps:$4 sm:$0xff]  }
  0x30   :  { %680 = vmatpush1.bf16.msra.mxu1 %v1036_v5  ;;  %764 = vmatpush1.bf16.msra.mxu0 %v1068_v15  ;;  %v51_v28 = vld [vmem:[#allocation3 + $0x8] sm:$0xff]  ;;  %v58_v29 = vld [vmem:[#allocation3 + $0x40] sm:$0xff]  ;;  %v1094_v34 = vld [vmem:[#allocation5 + $0x264] ss:$8 sps:$4 sm:$0xff]   ;;  %vm671_vm0 = vcmask 130048   ;;  %vm897_vm5 = vcmask 7168  }
  0x31   :  { %681 = vmatprep.subr.bf16.mxu1 %v1037_v6  ;;  %765 = vmatprep.subr.bf16.mxu0 %v1070_v16  ;;  %v65_v31 = vpack.c.bf16 %v58_v29, %v51_v28  ;;  %v1055_v32 = vld [vmem:[#allocation5 + $0x94] ss:$8 sps:$4 sm:$0xff]   ;;  %v1092_v33 = vld [vmem:[#allocation5 + $0x250] ss:$8 sps:$4 sm:$0xff]   ;;  %v1060_v36 = vld [vmem:[#allocation5 + $0xa4] ss:$8 sps:$4 sm:$0xff]  }
  0x32   :  { %v1057_v35 = vld [vmem:[#allocation5 + $0x90] ss:$8 sps:$4 sm:$0xff]   ;;  %v1099_v37 = vld [vmem:[#allocation5 + $0x260] ss:$8 sps:$4 sm:$0xff]   ;;  %v1100_v38 = vld [vmem:[#allocation5 + $0x274] ss:$8 sps:$4 sm:$0xff]  }
  0x33   :  { %707 = vmatprep.mubr.bf16.mxu1 %v65_v31  ;;  %v1063_v39 = vld [vmem:[#allocation5 + $0xa0] ss:$8 sps:$4 sm:$0xff]   ;;  %v1066_v40 = vld [vmem:[#allocation5 + $0xb4] ss:$8 sps:$4 sm:$0xff]   ;;  %v1105_v41 = vld [vmem:[#allocation5 + $0x270] ss:$8 sps:$4 sm:$0xff]  }
  0x34   :  { %682 = vmatpush1.bf16.msra.mxu1 %v1039_v7  ;;  %766 = vmatpush1.bf16.msra.mxu0 %v1074_v18  ;;  %v1106_v42 = vld [vmem:[#allocation5 + $0x284] ss:$8 sps:$4 sm:$0xff]   ;;  %v1069_v43 = vld [vmem:[#allocation5 + $0xb0] ss:$8 sps:$4 sm:$0xff]   ;;  %v1111_v45 = vld [vmem:[#allocation5 + $0x280] ss:$8 sps:$4 sm:$0xff]  }
  0x35   :  { %683 = vmatprep.subr.bf16.mxu1 %v1040_v8  ;;  %767 = vmatprep.subr.bf16.mxu0 %v1076_v19  ;;  %v1072_v44 = vld [vmem:[#allocation5 + $0xc4] ss:$8 sps:$4 sm:$0xff]   ;;  %v1112_v46 = vld [vmem:[#allocation5 + $0x294] ss:$8 sps:$4 sm:$0xff]   ;;  %v1075_v47 = vld [vmem:[#allocation5 + $0xc0] ss:$8 sps:$4 sm:$0xff]  }
  0x36   :  { %v1078_v48 = vld [vmem:[#allocation5 + $0xd4] ss:$8 sps:$4 sm:$0xff]   ;;  %v1117_v49 = vld [vmem:[#allocation5 + $0x290] ss:$8 sps:$4 sm:$0xff]   ;;  %v1118_v50 = vld [vmem:[#allocation5 + $0x2a4] ss:$8 sps:$4 sm:$0xff]  }
  0x37   :  { %v1081_v51 = vld [vmem:[#allocation5 + $0xd0] ss:$8 sps:$4 sm:$0xff]   ;;  %v1084_v52 = vld [vmem:[#allocation5 + $0xe4] ss:$8 sps:$4 sm:$0xff]   ;;  %v1123_v53 = vld [vmem:[#allocation5 + $0x2a0] ss:$8 sps:$4 sm:$0xff]  }
  0x38   :  { %684 = vmatpush1.bf16.msra.mxu1 %v1042_v10  ;;  %768 = vmatpush1.bf16.msra.mxu0 %v1080_v22  ;;  %v1124_v54 = vld [vmem:[#allocation5 + $0x2b4] ss:$8 sps:$4 sm:$0xff]   ;;  %v1087_v55 = vld [vmem:[#allocation5 + $0xe0] ss:$8 sps:$4 sm:$0xff]   ;;  %v1129_v57 = vld [vmem:[#allocation5 + $0x2b0] ss:$8 sps:$4 sm:$0xff]  }
  0x39   :  { %685 = vmatprep.subr.bf16.mxu1 %v1043_v11  ;;  %769 = vmatprep.subr.bf16.mxu0 %v1082_v23  ;;  %v1090_v56 = vld [vmem:[#allocation5 + $0xf4] ss:$8 sps:$4 sm:$0xff]   ;;  %v1093_v60 = vld [vmem:[#allocation5 + $0xf0] ss:$8 sps:$4 sm:$0xff]   ;;  %v1130_v61 = vld [vmem:[#allocation5 + $0x2c4] ss:$8 sps:$4 sm:$0xff]  }
  0x3a   :  { %v55_v58 = vld [vmem:[#allocation3 + $0x28] sm:$0xff]  ;;  %v62_v59 = vld [vmem:[#allocation3 + $0x60] sm:$0xff]  ;;  %v57_v0 = vld [vmem:[#allocation3 + $0x38] sm:$0xff]  ;;  %v1237_v28 = vmov 0  }
  0x3b   :  { %v69_v62 = vpack.c.bf16 %v62_v59, %v55_v58  ;;  %v50_v63 = vld [vmem:[#allocation3] sm:$0xff]  ;;  %v1098_v1 = vld [vmem:[#allocation5 + $0x104] ss:$8 sps:$4 sm:$0xff]   ;;  %v1135_v2 = vld [vmem:[#allocation5 + $0x2c0] ss:$8 sps:$4 sm:$0xff]  }
  0x3c   :  { %686 = vmatpush1.bf16.msra.mxu1 %v1045_v14  ;;  %770 = vmatpush1.bf16.msra.mxu0 %v1086_v26  ;;  %v64_v3 = vpack.c.bf16 %v57_v0, %v50_v63  ;;  %v1136_v4 = vld [vmem:[#allocation5 + $0x2d4] ss:$8 sps:$4 sm:$0xff]   ;;  %v1096_v5 = vld [vmem:[#allocation5 + $0x100] ss:$8 sps:$4 sm:$0xff]   ;;  %v1141_v7 = vld [vmem:[#allocation5 + $0x2d0] ss:$8 sps:$4 sm:$0xff]  }
  0x3d   :  { %687 = vmatprep.subr.bf16.mxu1 %v1046_v17  ;;  %771 = vmatprep.subr.bf16.mxu0 %v1088_v27  ;;  %v1104_v6 = vld [vmem:[#allocation5 + $0x114] ss:$8 sps:$4 sm:$0xff]   ;;  %v1142_v8 = vld [vmem:[#allocation5 + $0x2e4] ss:$8 sps:$4 sm:$0xff]   ;;  %v1102_v9 = vld [vmem:[#allocation5 + $0x110] ss:$8 sps:$4 sm:$0xff]  }
  0x3e   :  { %793 = vmatprep.mubr.bf16.mxu0 %v69_v62  ;;  %v1110_v10 = vld [vmem:[#allocation5 + $0x124] ss:$8 sps:$4 sm:$0xff]   ;;  %v1147_v12 = vld [vmem:[#allocation5 + $0x2e0] ss:$8 sps:$4 sm:$0xff]   ;;  %v1148_v14 = vld [vmem:[#allocation5 + $0x2f4] ss:$8 sps:$4 sm:$0xff]  }
  0x3f   :  { %v53_v11 = vld [vmem:[#allocation3 + $0x18] sm:$0xff]  ;;  %v60_v13 = vld [vmem:[#allocation3 + $0x50] sm:$0xff]  ;;  %v1116_v17 = vld [vmem:[#allocation5 + $0x134] ss:$8 sps:$4 sm:$0xff]  }
  0x40   :  { %688 = vmatpush1.bf16.msra.mxu1 %v1048_v20  ;;  %772 = vmatpush1.bf16.msra.mxu0 %v1092_v33  ;;  %v67_v15 = vpack.c.bf16 %v60_v13, %v53_v11  ;;  %v1108_v16 = vld [vmem:[#allocation5 + $0x120] ss:$8 sps:$4 sm:$0xff]   ;;  %v1153_v18 = vld [vmem:[#allocation5 + $0x2f0] ss:$8 sps:$4 sm:$0xff]   ;;  %v1122_v23 = vld [vmem:[#allocation5 + $0x144] ss:$8 sps:$4 sm:$0xff]  }
  0x41   :  { %689 = vmatprep.subr.bf16.mxu1 %v1049_v21  ;;  %773 = vmatprep.subr.bf16.mxu0 %v1094_v34  ;;  %v54_v19 = vld [vmem:[#allocation3 + $0x20] sm:$0xff]  ;;  %v61_v20 = vld [vmem:[#allocation3 + $0x58] sm:$0xff]  ;;  %v56_v31 = vld [vmem:[#allocation3 + $0x30] sm:$0xff] }
  0x42   :  { %v1162_v21 = vld [vmem:[#allocation5 + $0x304] ss:$8 sps:$4 sm:$0xff]   ;;  %v1114_v22 = vld [vmem:[#allocation5 + $0x130] ss:$8 sps:$4 sm:$0xff]   ;;  %v1120_v26 = vld [vmem:[#allocation5 + $0x140] ss:$8 sps:$4 sm:$0xff]  }
  0x43   :  { %v1128_v27 = vld [vmem:[#allocation5 + $0x154] ss:$8 sps:$4 sm:$0xff]   ;;  %v1126_v29 = vld [vmem:[#allocation5 + $0x150] ss:$8 sps:$4 sm:$0xff]   ;;  %v1132_v33 = vld [vmem:[#allocation5 + $0x160] ss:$8 sps:$4 sm:$0xff]  }
  0x44   :  { %690 = vmatpush1.bf16.msra.mxu1 %v1051_v24  ;;  %774 = vmatpush1.bf16.msra.mxu0 %v1099_v37  ;;  %v68_v24 = vpack.c.bf16 %v61_v20, %v54_v19  ;;  %v1140_v34 = vld [vmem:[#allocation5 + $0x174] ss:$8 sps:$4 sm:$0xff]   ;;  %v1146_v37 = vld [vmem:[#allocation5 + $0x184] ss:$8 sps:$4 sm:$0xff]   ;;  %v169_v63 = vld [vmem:[%s1309_s2] sm:$0x3] }
  0x45   :  { %691 = vmatprep.subr.bf16.mxu1 %v1052_v25  ;;  %775 = vmatprep.subr.bf16.mxu0 %v1100_v38  ;;  %v1160_v25 = vld [vmem:[#allocation5 + $0x300] ss:$8 sps:$4 sm:$0xff]  }
  0x46   :  { %v1144_v38 = vld [vmem:[#allocation5 + $0x180] ss:$8 sps:$4 sm:$0xff]  }
  0x48   :  { %692 = vmatpush1.bf16.msra.mxu1 %v1054_v30  ;;  %776 = vmatpush1.bf16.msra.mxu0 %v1105_v41  ;;  %v1134_v30 = vld [vmem:[#allocation5 + $0x164] ss:$8 sps:$4 sm:$0xff]  }
  0x49   :  { %693 = vmatprep.subr.bf16.mxu1 %v1055_v32  ;;  %777 = vmatprep.subr.bf16.mxu0 %v1106_v42  ;;  %v63_v32 = vld [vmem:[#allocation3 + $0x68] sm:$0xff]  ;;  %v1156_v41 = vld [vmem:[#allocation5 + $0x1a4] ss:$8 sps:$4 sm:$0xff]   ;;  %v1154_v42 = vld [vmem:[#allocation5 + $0x1a0] ss:$8 sps:$4 sm:$0xff]  }
  0x4c   :  { %694 = vmatpush1.bf16.msra.mxu1 %v1057_v35  ;;  %778 = vmatpush1.bf16.msra.mxu0 %v1111_v45  ;;  %v70_v35 = vpack.c.bf16 %v63_v32, %v56_v31  ;;  %v1165_v45 = vld [vmem:[#allocation5 + $0x1c4] ss:$8 sps:$4 sm:$0xff]   ;;  %v882_v32 = vstv %s1311_s4 }
  0x4d   :  { %695 = vmatprep.subr.bf16.mxu1 %v1060_v36  ;;  %779 = vmatprep.subr.bf16.mxu0 %v1112_v46  ;;  %v1138_v36 = vld [vmem:[#allocation5 + $0x170] ss:$8 sps:$4 sm:$0xff]   ;;  %v1163_v46 = vld [vmem:[#allocation5 + $0x1c0] ss:$8 sps:$4 sm:$0xff]  }
  0x50   :  { %696 = vmatpush1.bf16.msra.mxu1 %v1063_v39  ;;  %780 = vmatpush1.bf16.msra.mxu0 %v1117_v49  ;;  %v1152_v39 = vld [vmem:[#allocation5 + $0x194] ss:$8 sps:$4 sm:$0xff]   ;;  %v1171_v49 = vld [vmem:[#allocation5 + $0x1e4] ss:$8 sps:$4 sm:$0xff]  }
  0x51   :  { %697 = vmatprep.subr.bf16.mxu1 %v1066_v40  ;;  %781 = vmatprep.subr.bf16.mxu0 %v1118_v50  ;;  %v1150_v40 = vld [vmem:[#allocation5 + $0x190] ss:$8 sps:$4 sm:$0xff]   ;;  %v1169_v50 = vld [vmem:[#allocation5 + $0x1e0] ss:$8 sps:$4 sm:$0xff]  }
  0x54   :  { %698 = vmatpush1.bf16.msra.mxu1 %v1069_v43  ;;  %782 = vmatpush1.bf16.msra.mxu0 %v1123_v53  ;;  %v1159_v43 = vld [vmem:[#allocation5 + $0x1b4] ss:$8 sps:$4 sm:$0xff]   ;;  %v52_v53 = vld [vmem:[#allocation3 + $0x10] sm:$0xff] }
  0x55   :  { %699 = vmatprep.subr.bf16.mxu1 %v1072_v44  ;;  %783 = vmatprep.subr.bf16.mxu0 %v1124_v54  ;;  %v1157_v44 = vld [vmem:[#allocation5 + $0x1b0] ss:$8 sps:$4 sm:$0xff]  }
  0x56   :  { %v59_v54 = vld [vmem:[#allocation3 + $0x48] sm:$0xff] }
  0x58   :  { %700 = vmatpush1.bf16.msra.mxu1 %v1075_v47  ;;  %784 = vmatpush1.bf16.msra.mxu0 %v1129_v57  ;;  %v1168_v47 = vld [vmem:[#allocation5 + $0x1d4] ss:$8 sps:$4 sm:$0xff]  }
  0x59   :  { %701 = vmatprep.subr.bf16.mxu1 %v1078_v48  ;;  %785 = vmatprep.subr.bf16.mxu0 %v1130_v61  ;;  %v1166_v48 = vld [vmem:[#allocation5 + $0x1d0] ss:$8 sps:$4 sm:$0xff]  }
  0x5c   :  { %702 = vmatpush1.bf16.msra.mxu1 %v1081_v51  ;;  %786 = vmatpush1.bf16.msra.mxu0 %v1135_v2  ;;  %v1174_v51 = vld [vmem:[#allocation5 + $0x1f4] ss:$8 sps:$4 sm:$0xff]  }
  0x5d   :  { %703 = vmatprep.subr.bf16.mxu1 %v1084_v52  ;;  %787 = vmatprep.subr.bf16.mxu0 %v1136_v4  ;;  %v1172_v52 = vld [vmem:[#allocation5 + $0x1f0] ss:$8 sps:$4 sm:$0xff]  }
  0x60   :  { %704 = vmatpush1.bf16.msra.mxu1 %v1087_v55  ;;  %788 = vmatpush1.bf16.msra.mxu0 %v1141_v7  ;;  %v66_v55 = vpack.c.bf16 %v59_v54, %v52_v53 }
  0x61   :  { %705 = vmatprep.subr.bf16.mxu1 %v1090_v56  ;;  %789 = vmatprep.subr.bf16.mxu0 %v1142_v8 }
  0x64   :  { %706 = vmatpush1.bf16.msra.mxu1 %v1093_v60  ;;  %790 = vmatpush1.bf16.msra.mxu0 %v1147_v12  ;;  %v171_v60 = vlaneseq }
  0x65   :  { %718 = vmatprep.subr.bf16.mxu1 %v1098_v1  ;;  %791 = vmatprep.subr.bf16.mxu0 %v1148_v14 }
  0x66   :  { %v172_v61 = vshrl.u32 %v171_v60, 7 }
  0x67   :  { %708 = vmatmul.mubr.bf16.vlgmr.msra.gmra.mrb[0].mxu1 %v64_v3 }
  0x68   :  { %719 = vmatpush1.bf16.msra.mxu1 %v1096_v5  ;;  %750 = vmatprep.mubr.bf16.mxu1 %v67_v15  ;;  %v173_v62 = vsub.s32 0, %v172_v61  ;;  %v177_v0 = vsub.s32 1, %v172_v61 }
  0x69   :  { %720 = vmatprep.subr.bf16.mxu1 %v1104_v6  ;;  %792 = vmatpush1.bf16.msra.mxu0 %v1153_v18  ;;  %v859_v6 = vld [vmem:[%s1310_s3] sm:$0x3] }
  0x6a   :  { %804 = vmatprep.subr.bf16.mxu0 %v1162_v21  ;;  %v174_v1 = vrot.slane %v169_v63, %v173_v62  ;;  %v178_v2 = vrot.slane %v169_v63, %v177_v0  ;;  %v864_v14 = vrot.slane %v859_v6, %v173_v62 }
  0x6c   :  { %721 = vmatpush1.bf16.msra.mxu1 %v1102_v9  ;;  %794 = vmatmul.mubr.bf16.vlgmr.msra.gmra.mrb[0].mxu0 %v68_v24 }
  0x6d   :  { %722 = vmatprep.subr.bf16.mxu1 %v1110_v10  ;;  %805 = vmatpush1.bf16.msra.mxu0 %v1160_v25 }
  0x6e   :  { %836 = vmatprep.mubr.bf16.mxu0 %v1237_v28 }
  0x70   :  { %723 = vmatpush1.bf16.msra.mxu1 %v1108_v16 }
  0x71   :  { %724 = vmatprep.subr.bf16.mxu1 %v1116_v17  ;;  %v868_v17 = vrot.slane %v859_v6, %v177_v0 }
  0x74   :  { %725 = vmatpush1.bf16.msra.mxu1 %v1114_v22 }
  0x75   :  { %726 = vmatprep.subr.bf16.mxu1 %v1122_v23 }
  0x78   :  { %727 = vmatpush1.bf16.msra.mxu1 %v1120_v26  ;;  %1004 = vmatmul.mubr.msk.bf16.vlgmr.msra.gmra.mrb[0].mxu0 %vm671_vm0, %v70_v35 }
  0x79   :  { %728 = vmatprep.subr.bf16.mxu1 %v1128_v27 }
  0x7c   :  { %729 = vmatpush1.bf16.msra.mxu1 %v1126_v29 }
  0x7d   :  { %730 = vmatprep.subr.bf16.mxu1 %v1134_v30 }
  0x80   :  { %731 = vmatpush1.bf16.msra.mxu1 %v1132_v33 }
  0x81   :  { %732 = vmatprep.subr.bf16.mxu1 %v1140_v34 }
  0x84   :  { %733 = vmatpush1.bf16.msra.mxu1 %v1138_v36 }
  0x85   :  { %734 = vmatprep.subr.bf16.mxu1 %v1146_v37 }
  0x88   :  { %735 = vmatpush1.bf16.msra.mxu1 %v1144_v38 }
  0x89   :  { %736 = vmatprep.subr.bf16.mxu1 %v1152_v39 }
  0x8c   :  { %737 = vmatpush1.bf16.msra.mxu1 %v1150_v40 }
  0x8d   :  { %738 = vmatprep.subr.bf16.mxu1 %v1156_v41 }
  0x90   :  { %739 = vmatpush1.bf16.msra.mxu1 %v1154_v42 }
  0x91   :  { %740 = vmatprep.subr.bf16.mxu1 %v1159_v43 }
  0x94   :  { %741 = vmatpush1.bf16.msra.mxu1 %v1157_v44 }
  0x95   :  { %742 = vmatprep.subr.bf16.mxu1 %v1165_v45 }
  0x98   :  { %743 = vmatpush1.bf16.msra.mxu1 %v1163_v46 }
  0x99   :  { %744 = vmatprep.subr.bf16.mxu1 %v1168_v47 }
  0x9c   :  { %745 = vmatpush1.bf16.msra.mxu1 %v1166_v48 }
  0x9d   :  { %746 = vmatprep.subr.bf16.mxu1 %v1171_v49 }
  0xa0   :  { %747 = vmatpush1.bf16.msra.mxu1 %v1169_v50 }
  0xa1   :  { %748 = vmatprep.subr.bf16.mxu1 %v1174_v51 }
  0xa4   :  { %749 = vmatpush1.bf16.msra.mxu1 %v1172_v52 }
  0xa7   :  { %751 = vmatmul.mubr.bf16.vlgmr.msra.gmra.mrb[0].mxu1 %v66_v55 }
 0x14b   :  { %v838_v56 = vpop.f32.mrb[0].mxu0 }
 0x14c   :  { %v840_v57 = vpop.f32.mrb[1].mxu0 }
 0x14d   :  { %v842_v58 = vpop.f32.mrb[2].mxu0 }
 0x14e   :  { %v844_v59 = vpop.f32.mrb[3].mxu0 }
 0x17a   :  { %v752_v3 = vpop.f32.mrb[0].mxu1 }
 0x17b   :  { %v1005_v4 = vadd.f32 %v752_v3, %v174_v1  ;;  %v754_v5 = vpop.f32.mrb[1].mxu1 }
 0x17c   :  { %v1007_v7 = vadd.f32 %v754_v5, %v178_v2  ;;  %v756_v8 = vpop.f32.mrb[2].mxu1 }
 0x17d   :  { %v1006_v9 = vadd.f32 %v1005_v4, %v838_v56  ;;  %v1009_v10 = vadd.f32 %v756_v8, %v174_v1  ;;  %v758_v11 = vpop.f32.mrb[3].mxu1 }
 0x17e   :  { %v1008_v12 = vadd.f32 %v1007_v7, %v840_v57  ;;  %v1011_v13 = vadd.f32 %v758_v11, %v178_v2 }
 0x17f   :  { %v851_v15 = vmul.f32 0.2, %v1006_v9  ;;  %v1010_v16 = vadd.f32 %v1009_v10, %v842_v58  ;;  %vm847_vm1 = vcmp.ge.f32.partialorder %v1006_v9, 0.0 }
 0x180   :  { %v852_v18 = vmul.f32 0.2, %v1008_v12  ;;  %v1012_v19 = vadd.f32 %v1011_v13, %v844_v59  ;;  %vm848_vm2 = vcmp.ge.f32.partialorder %v1008_v12, 0.0 }
 0x181   :  { %v853_v20 = vmul.f32 0.2, %v1010_v16  ;;  %v855_v21 = vsel %vm847_vm1, %v1006_v9, %v851_v15  ;;  %vm849_vm3 = vcmp.ge.f32.partialorder %v1010_v16, 0.0 }
 0x182   :  { %v854_v22 = vmul.f32 0.2, %v1012_v19  ;;  %v856_v23 = vsel %vm848_vm2, %v1008_v12, %v852_v18  ;;  %v871_v24 = vmul.f32 %v864_v14, %v855_v21  ;;  %vm850_vm4 = vcmp.ge.f32.partialorder %v1012_v19, 0.0 }
 0x183   :  { %v872_v25 = vmul.f32 %v868_v17, %v856_v23  ;;  %v857_v26 = vsel %vm849_vm3, %v1010_v16, %v853_v20 }
 0x184   :  { %v858_v27 = vsel %vm850_vm4, %v1012_v19, %v854_v22  ;;  %v873_v28 = vmul.f32 %v864_v14, %v857_v26 }
 0x185   :  { %v875_v29 = vadd.f32 %v872_v25, %v871_v24  ;;  %v874_v30 = vmul.f32 %v868_v17, %v858_v27 }
 0x187   :  { %876 = vadd.xlane.f32.xlu0 %v875_v29  ;;  %v878_v31 = vadd.f32 %v874_v30, %v873_v28 }
 0x18b   :  { %879 = vadd.xlane.f32.xlu0 %v878_v31 }
 0x214   :  { %v877_v33 = vpop.xlane.xlu0 %876 }
 0x215   :  { %v883_v34 = vadd.f32 %v882_v32, %v877_v33 }
 0x217   :  { %v885_v35 = vsub.f32 0.0, %v883_v34 }
 0x218   :  { %v880_v36 = vpop.xlane.xlu0 %879 }
 0x219   :  { %v887_v37 = vmul.f32 1.442695, %v885_v35  ;;  %v884_v38 = vadd.f32 %v882_v32, %v880_v36 }
 0x21b   :  { %1175 = vpow2.f32 %v887_v37  ;;  %v886_v39 = vsub.f32 0.0, %v884_v38 }
 0x21d   :  { %v889_v40 = vmul.f32 1.442695, %v886_v39 }
 0x21f   :  { %1177 = vpow2.f32 %v889_v40 }
 0x225   :  { %v1176_v41 = vpop.eup %1175 }
 0x226   :  { %v891_v42 = vadd.f32 1.0, %v1176_v41 }
 0x228   :  { %1179 = vrcp.f32 %v891_v42 }
 0x229   :  { %v1178_v43 = vpop.eup %1177 }
 0x22a   :  { %v892_v44 = vadd.f32 1.0, %v1178_v43 }
 0x22c   :  { %1181 = vrcp.f32 %v892_v44 }
 0x232   :  { %v1180_v45 = vpop.eup %1179 }
 0x233   :  { %898 = vst.msk [vmem:[%s1312_s5] sm:$0xff] %vm897_vm5, %v1180_v45 }
 0x236   :  { %v1182_v46 = vpop.eup %1181 }
 0x237   :  { %899 = vst.msk [vmem:[%s1312_s5 + $0x8] sm:$0xff] %vm897_vm5, %v1182_v46 }
 0x238   :  { %904 = vsyncpa [#allocation4], 1 }
 0x239   :  { %905 = vsyncpa [#allocation6], 1 }

</bundles_post_ra>
